<compile_context>
chip_gen: v7x
topology: tpu7x:2x2x1
jax: 0.10.0
libtpu: 0.0.40
codegen_flags: <defaults>
</compile_context>

<pallas_src>
import functools

import jax
import jax.numpy as jnp
from jax.experimental import pallas as pl
from jax.experimental.pallas import tpu as pltpu


def _round_up(x, m):
    return ((x + m - 1) // m) * m


def _fused_fc_kernel(x_ref, w_ref, b_ref, o_ref):
    """One fused MXU matmul for both heads: o = x @ [Wc|Wd] + [bc|bd]."""
    acc = jnp.dot(x_ref[...], w_ref[...], preferred_element_type=jnp.float32)
    o_ref[...] = (acc + b_ref[...].astype(jnp.float32)).astype(o_ref.dtype)


@functools.partial(jax.jit, static_argnames=("block_b",))
def custom_fc_forward(x, wc, bc, wd, bd, *, block_b=512):
    """Pallas wrapper reproducing CustomFC.forward.

    x  : (B, in_features)
    wc : (in_features, num_crops)     bc : (1, num_crops)
    wd : (in_features, num_diseases)  bd : (1, num_diseases)
    returns dict {'crop': (B, num_crops), 'disease': (B, num_diseases)}
    """
    B, F = x.shape
    NC = wc.shape[1]
    ND = wd.shape[1]
    NOUT = NC + ND

    # --- Fuse the two heads into a single weight / bias (tiny, fused by XLA).
    w = jnp.concatenate([wc, wd], axis=1)          # (F, NOUT)
    b = jnp.concatenate([bc, bd], axis=1)          # (1, NOUT)

    # --- Pad output lanes to a multiple of 128 for unmasked, lane-dense stores.
    NOUT_P = _round_up(NOUT, 128)
    if NOUT_P != NOUT:
        w = jnp.pad(w, ((0, 0), (0, NOUT_P - NOUT)))
        b = jnp.pad(b, ((0, 0), (0, NOUT_P - NOUT)))

    # --- Batch tiling: TB multiple of 8 sublanes; cap block_b by an adaptive
    #     row budget so the double-buffered x tile stays under ~4 MiB even for
    #     very wide feature vectors.
    itemsize = jnp.dtype(x.dtype).itemsize
    max_tb_rows = max(8, (4 * 1024 * 1024) // max(1, F * itemsize))
    TB = _round_up(max(1, min(block_b, B, max_tb_rows)), 8)
    B_P = _round_up(B, TB)
    x_p = jnp.pad(x, ((0, B_P - B), (0, 0))) if B_P != B else x

    grid = (B_P // TB,)
    cost = pl.CostEstimate(
        flops=2 * B_P * F * NOUT_P,
        transcendentals=0,
        bytes_accessed=B_P * F * itemsize + F * NOUT_P * itemsize
        + NOUT_P * itemsize + B_P * NOUT_P * itemsize,
    )

    fused = pl.pallas_call(
        _fused_fc_kernel,
        out_shape=jax.ShapeDtypeStruct((B_P, NOUT_P), x.dtype),
        grid_spec=pl.GridSpec(
            grid=grid,
            in_specs=[
                pl.BlockSpec((TB, F), lambda i: (i, 0)),      # x: batch-tiled
                pl.BlockSpec((F, NOUT_P), lambda i: (0, 0)),  # fused weight (resident)
                pl.BlockSpec((1, NOUT_P), lambda i: (0, 0)),  # fused bias (resident)
            ],
            out_specs=pl.BlockSpec((TB, NOUT_P), lambda i: (i, 0)),
        ),
        compiler_params=pltpu.CompilerParams(
            dimension_semantics=("parallel",)),
        cost_estimate=cost,
    )(x_p, w, b)

    crop = fused[:B, :NC]
    disease = fused[:B, NC:NOUT]
    return {"crop": crop, "disease": disease}


def init_custom_fc_params(key, in_features, num_crops, num_diseases,
                          dtype=jnp.float32):
    """Deterministic init mirroring PyTorch nn.Linear (U(-1/sqrt(in), 1/sqrt(in)))."""
    k_wc, k_bc, k_wd, k_bd = jax.random.split(key, 4)
    bound = 1.0 / jnp.sqrt(jnp.asarray(in_features, jnp.float32))
    wc = jax.random.uniform(k_wc, (in_features, num_crops), dtype,
                            minval=-bound, maxval=bound)
    bc = jax.random.uniform(k_bc, (1, num_crops), dtype,
                            minval=-bound, maxval=bound)
    wd = jax.random.uniform(k_wd, (in_features, num_diseases), dtype,
                            minval=-bound, maxval=bound)
    bd = jax.random.uniform(k_bd, (1, num_diseases), dtype,
                            minval=-bound, maxval=bound)
    return wc, bc, wd, bd


if __name__ == "__main__":
    # Small shapes consistent with the module's forward: x is (batch, in_features).
    batch = 8
    in_features = 32
    num_crops = 16
    num_diseases = 8

    key = jax.random.PRNGKey(0)
    k_x, k_p = jax.random.split(key)
    x = jax.random.normal(k_x, (batch, in_features), jnp.float32)
    wc, bc, wd, bd = init_custom_fc_params(k_p, in_features, num_crops,
                                           num_diseases)

    out = custom_fc_forward(x, wc, bc, wd, bd)
    jax.block_until_ready(out)

    # Pure-JAX reference check.
    ref_crop = x @ wc + bc
    ref_disease = x @ wd + bd
    assert jnp.allclose(out["crop"], ref_crop, atol=1e-5, rtol=1e-5)
    assert jnp.allclose(out["disease"], ref_disease, atol=1e-5, rtol=1e-5)
    assert out["crop"].shape == (batch, num_crops)
    assert out["disease"].shape == (batch, num_diseases)

    print("KERNEL_OK")
</pallas_src>

<mosaic_0001>
module attributes {stable_mosaic.version = 11 : i64} {
  func.func @_fused_fc_kernel(%arg0: i32, %arg1: memref<8x32xf32, #tpu.memory_space<vmem>>, %arg2: memref<32x128xf32, #tpu.memory_space<vmem>>, %arg3: memref<1x128xf32, #tpu.memory_space<vmem>>, %arg4: memref<8x128xf32, #tpu.memory_space<vmem>>) attributes {dimension_semantics = [#tpu.dimension_semantics<parallel>], iteration_bounds = array<i64: 1>, scalar_prefetch = 0 : i64, scratch_operands = 0 : i64, tpu.core_type = #tpu.core_type<tc>, window_params = [{transform_indices = @transform_0, window_bounds = array<i64: 8, 32>}, {pipeline_mode = #tpu.pipeline_mode<synchronous>, transform_indices = @transform_1, window_bounds = array<i64: 32, 128>}, {pipeline_mode = #tpu.pipeline_mode<synchronous>, transform_indices = @transform_2, window_bounds = array<i64: 1, 128>}, {transform_indices = @transform_3, window_bounds = array<i64: 8, 128>}]} {
    %c0 = arith.constant 0 : index
    %c0_0 = arith.constant 0 : index
    %0 = vector.load %arg1[%c0, %c0_0] : memref<8x32xf32, #tpu.memory_space<vmem>>, vector<8x32xf32>
    %c0_1 = arith.constant 0 : index
    %c0_2 = arith.constant 0 : index
    %1 = vector.load %arg2[%c0_1, %c0_2] : memref<32x128xf32, #tpu.memory_space<vmem>>, vector<32x128xf32>
    %cst = arith.constant dense<0.000000e+00> : vector<8x128xf32>
    %2 = tpu.matmul %0, %1, %cst {dimension_numbers = #tpu.dot_dimension_numbers<[1], [0], [0], [1], [0, 0, 1, 1], [], []>} : vector<8x32xf32>, vector<32x128xf32>, vector<8x128xf32> -> vector<8x128xf32>
    %c0_3 = arith.constant 0 : index
    %c0_4 = arith.constant 0 : index
    %3 = vector.load %arg3[%c0_3, %c0_4] : memref<1x128xf32, #tpu.memory_space<vmem>>, vector<1x128xf32>
    %4 = vector.broadcast %3 : vector<1x128xf32> to vector<8x128xf32>
    %5 = arith.addf %2, %4 : vector<8x128xf32>
    %c0_5 = arith.constant 0 : index
    %c0_6 = arith.constant 0 : index
    %6 = vector.load %arg4[%c0_5, %c0_6] : memref<8x128xf32, #tpu.memory_space<vmem>>, vector<8x128xf32>
    tpu.vector_store %arg4[%c0_5, %c0_6], %5 {strides = array<i32>} : memref<8x128xf32, #tpu.memory_space<vmem>>, vector<8x128xf32>,
    return
  }
  func.func @transform_0(%arg0: i32) -> (i32, i32) {
    %c0_i32 = arith.constant 0 : i32
    %c0_i32_0 = arith.constant 0 : i32
    return %arg0, %c0_i32 : i32, i32
  }
  func.func @transform_1(%arg0: i32) -> (i32, i32) {
    %c0_i32 = arith.constant 0 : i32
    %c0_i32_0 = arith.constant 0 : i32
    %c0_i32_1 = arith.constant 0 : i32
    return %c0_i32, %c0_i32_0 : i32, i32
  }
  func.func @transform_2(%arg0: i32) -> (i32, i32) {
    %c0_i32 = arith.constant 0 : i32
    %c0_i32_0 = arith.constant 0 : i32
    %c0_i32_1 = arith.constant 0 : i32
    return %c0_i32, %c0_i32_0 : i32, i32
  }
  func.func @transform_3(%arg0: i32) -> (i32, i32) {
    %c0_i32 = arith.constant 0 : i32
    %c0_i32_0 = arith.constant 0 : i32
    return %arg0, %c0_i32 : i32, i32
  }
}

</mosaic_0001>

<bundles_post_ra>
// kernel: custom_fc_forward.1
= control target key start
LH: loop header
LB: loop body
LE: loop exit
PB: predicated region body
PF: predicated region fallthrough
CT: control target
= control target key end

     0   :  { %v132_v0 = vmov 0.0|0.0   ;;  %vm133_vm0 = vmmov 0   ;;  %v134_v4 = vmov 0.0   ;;  %vm26_vm1 = vcmask 261120   ;;  %s176_s1 = inlined_call_operand.vmem [shape: f32[32,128], index: 1, kind: input, shape index: {}]   ;;  %s177_s0 = inlined_call_operand.vmem [shape: f32[8,32], index: 0, kind: input, shape index: {}]   ;;  %s178_s2 = inlined_call_operand.vmem [shape: f32[1,128], index: 2, kind: input, shape index: {}]   ;;  %s179_s3 = inlined_call_operand.vmem [shape: f32[8,128], index: 3, kind: output, shape index: {}]  }
   0x1   :  { %123 = vmatprep.subr.bf16.mxu0 %v132_v0  ;;  %v15_v1 = vld [vmem:[%s176_s1] sm:$0xff]  ;;  %v16_v2 = vld [vmem:[%s176_s1 + $0x8] sm:$0xff]  ;;  %v17_v3 = vld [vmem:[%s176_s1 + $0x10] sm:$0xff]  ;;  %120 = vmatprep.mubr.msk.f32.mxu0 %vm133_vm0, %v134_v4 }
   0x2   :  { %v124_v5 = vpack.c.bf16 %v16_v2, %v15_v1  ;;  %v18_v6 = vld [vmem:[%s176_s1 + $0x18] sm:$0xff]  ;;  %v14_v8 = vld [vmem:[%s177_s0] sm:$0xff] }
   0x3   :  { %v127_v7 = vpack.c.bf16 %v18_v6, %v17_v3  ;;  %v105_v9 = vld [vmem:[%s178_s2] ss:$0 sm:$0xff] }
   0x4   :  { %125 = vmatpush3.bf16.msra.mxu0 %v124_v5 }
   0x5   :  { %126 = vmatprep.subr.bf16.mxu0 %v132_v0 }
   0x8   :  { %128 = vmatpush3.bf16.msra.mxu0 %v127_v7 }
   0xb   :  { %121 = vmatmul.mubr.msk.f32.vlgmr.msra.gmra.mrb[0].mxu0 %vm26_vm1, %v14_v8 }
  0xde   :  { %v96_v10 = vpop.f32.mrb[0].mxu0 }
  0xdf   :  { %v97_v11 = vadd.f32 %v105_v9, %v96_v10  ;;  %v122_v12 = vpop.f32.mrb[1].mxu0 }
  0xe1   :  { %100 = vst [vmem:[%s179_s3] sm:$0xff] %v97_v11 }

</bundles_post_ra>
